<compile_context>
chip_gen: v5e
topology: v5e:2x2
jax: 0.10.0
libtpu: 0.0.40
codegen_flags: <defaults>
</compile_context>

<pallas_src>
import functools

import jax
import jax.numpy as jnp
from jax.experimental import pallas as pl
from jax.experimental.pallas import tpu as pltpu


# ----------------------------------------------------------------------------
# Generation-aware sizing (VMEM budget, time tile, row tiles, core heuristic)
# ----------------------------------------------------------------------------
def _query_vmem_capacity():
    try:
        return int(pltpu.get_tpu_info().vmem_capacity_bytes), True
    except Exception:
        return 64 * 1024 * 1024, False      # conservative fallback, legal everywhere


_VMEM_CAP_BYTES, _VMEM_CAP_KNOWN = _query_vmem_capacity()
# Leave ~1/8 headroom for compiler scratch/spill: ~56 MiB on v7x, ~112 MiB v5e/v6e.
VMEM_LIMIT_BYTES = (_VMEM_CAP_BYTES * 7) // 8
_BIG_VMEM = _VMEM_CAP_BYTES >= 96 * 1024 * 1024
TIME_TILE = 16 if _BIG_VMEM else 8           # timesteps per sequential grid step
_MAX_ROW_TILE = 1024 if _BIG_VMEM else 512   # projection / merge row tiles
# v7x-like parts (64 MiB VMEM per core) have 2 TensorCores -> split the batch axis.
_MAYBE_DUAL_CORE = _VMEM_CAP_KNOWN and _VMEM_CAP_BYTES <= 64 * 1024 * 1024


def _pick_row_tile(n_rows, max_tile=None):
    """Largest sublane-aligned row tile that divides n_rows (else full extent)."""
    max_tile = _MAX_ROW_TILE if max_tile is None else max_tile
    for cand in (1024, 512, 256, 128, 64, 32, 16, 8):
        if cand <= max_tile and cand <= n_rows and n_rows % cand == 0:
            return cand
    return n_rows


def _pick_batch_tiles(batch):
    """Split the recurrence batch across two tiles only on dual-core parts and
    only when each half stays sublane-aligned."""
    if _MAYBE_DUAL_CORE and batch % 32 == 0:
        return 2
    return 1


# ----------------------------------------------------------------------------
# Single-buffering capability probe (pipeline_mode=pl.Buffered(1))
# ----------------------------------------------------------------------------
_SINGLE_BUFFER_OK = None


def _single_buffer_supported():
    """Probe (once) whether single-buffered constant blocks are supported."""
    global _SINGLE_BUFFER_OK
    if _SINGLE_BUFFER_OK is not None:
        return _SINGLE_BUFFER_OK
    try:
        const_spec = pl.BlockSpec((8, 128), lambda i: (0, 0),
                                  pipeline_mode=pl.Buffered(1))

        def _probe_kernel(c_ref, o_ref):
            o_ref[...] = c_ref[...]

        fn = pl.pallas_call(
            _probe_kernel,
            out_shape=jax.ShapeDtypeStruct((16, 128), jnp.float32),
            grid_spec=pltpu.PrefetchScalarGridSpec(
                num_scalar_prefetch=0, grid=(2,),
                in_specs=[const_spec],
                out_specs=pl.BlockSpec((8, 128), lambda i: (i, 0))),
            compiler_params=pltpu.CompilerParams(
                dimension_semantics=("arbitrary",)),
        )
        jax.block_until_ready(fn(jnp.zeros((8, 128), jnp.float32)))
        _SINGLE_BUFFER_OK = True
    except Exception:
        _SINGLE_BUFFER_OK = False
    return _SINGLE_BUFFER_OK


def _const_block_spec(block_shape, index_map):
    """BlockSpec for a block whose index never changes across the grid:
    single-buffer it when supported (halves its resident VMEM)."""
    if _single_buffer_supported():
        return pl.BlockSpec(block_shape, index_map, pipeline_mode=pl.Buffered(1))
    return pl.BlockSpec(block_shape, index_map)


# ----------------------------------------------------------------------------
# Pallas kernels
# ----------------------------------------------------------------------------
def _proj_bi_kernel(x_ref, w_ref, b_ref, gf_ref, gb_ref):
    """gi = x @ [W_ih_f | W_ih_b]^T + b_ih for a tile of T*B rows.

    Both directions come from ONE MXU matmul against the fused (D, 6H) weight;
    the result is split into gi_f / gi_b in-register before the stores."""
    x = x_ref[...].astype(w_ref.dtype)
    g = jnp.dot(x, w_ref[...], preferred_element_type=jnp.float32) + b_ref[...]
    gh = gf_ref.shape[-1]
    gf_ref[...] = g[:, :gh].astype(gf_ref.dtype)
    gb_ref[...] = g[:, gh:].astype(gb_ref.dtype)


def _proj_uni_kernel(x_ref, w_ref, b_ref, g_ref):
    """Hoisted input projection, single direction."""
    x = x_ref[...].astype(w_ref.dtype)
    g_ref[...] = (jnp.dot(x, w_ref[...], preferred_element_type=jnp.float32)
                  + b_ref[...]).astype(g_ref.dtype)


def _gru_cell(gi, gh, h, hidden):
    """PyTorch GRU cell gate math (gate order r, z, n); all math in f32."""
    H = hidden
    r = jax.nn.sigmoid(gi[:, :H] + gh[:, :H])
    z = jax.nn.sigmoid(gi[:, H:2 * H] + gh[:, H:2 * H])
    n = jnp.tanh(gi[:, 2 * H:] + r * gh[:, 2 * H:])
    return (1.0 - z) * n + z * h


def _bigru_block_kernel(len_ref, gi_f_ref, gi_b_ref,
                        whh_f_ref, whh_b_ref, bhh_f_ref, bhh_b_ref,
                        out_f_ref, out_b_ref, h_f_ref, h_b_ref):
    """Fused bidirectional GRU recurrence over one block of Tt timesteps.

    grid = (batch_tiles, time_blocks); time is sequential ("arbitrary").
    len_ref : (Bt, 1) int32 sequence lengths (constant per batch tile)
    gi_*    : (Tt, Bt, 3H) precomputed input projections
    whh_*   : (H, 3H) single-buffered constants, bhh_*: (1, 3H)
    out_*   : (Tt, Bt, H) per-direction outputs (0 at padded positions)
    h_*     : (Bt, H) f32 hidden-state carries (VMEM scratch across time blocks)
    """
    t_blk = pl.program_id(1)
    n_tblk = pl.num_programs(1)

    @pl.when(t_blk == 0)
    def _():
        h_f_ref[...] = jnp.zeros_like(h_f_ref)
        h_b_ref[...] = jnp.zeros_like(h_b_ref)

    Tt = gi_f_ref.shape[0]
    H = h_f_ref.shape[-1]

    # Hoist constant loads out of the unrolled time loop.
    lens = len_ref[...]                       # (Bt, 1) int32
    whh_f = whh_f_ref[...]
    whh_b = whh_b_ref[...]
    bhh_f = bhh_f_ref[...].astype(jnp.float32)
    bhh_b = bhh_b_ref[...].astype(jnp.float32)

    # Register-carried hidden state: one load before / one store after the tile.
    h_f = h_f_ref[...]
    h_b = h_b_ref[...]
    zeros = jnp.zeros_like(h_f)

    t0_f = t_blk * Tt
    t0_b = (n_tblk - 1 - t_blk) * Tt

    for i in range(Tt):                       # statically unrolled time tile
        # ---- forward direction: global timestep t0_f + i --------------------
        gh = jnp.dot(h_f.astype(whh_f.dtype), whh_f,
                     preferred_element_type=jnp.float32) + bhh_f
        h_new = _gru_cell(gi_f_ref[i], gh, h_f, H)
        valid = (t0_f + i) < lens                                   # (Bt, 1)
        h_f = jnp.where(valid, h_new, h_f)
        out_f_ref[i] = jnp.where(valid, h_new, zeros).astype(out_f_ref.dtype)

        # ---- backward direction: global timestep t0_b + (Tt-1-i) ------------
        j = Tt - 1 - i
        gh = jnp.dot(h_b.astype(whh_b.dtype), whh_b,
                     preferred_element_type=jnp.float32) + bhh_b
        h_new = _gru_cell(gi_b_ref[j], gh, h_b, H)
        valid = (t0_b + j) < lens
        h_b = jnp.where(valid, h_new, h_b)
        out_b_ref[j] = jnp.where(valid, h_new, zeros).astype(out_b_ref.dtype)

    h_f_ref[...] = h_f
    h_b_ref[...] = h_b


def _gru_block_kernel(len_ref, gi_ref, whh_ref, bhh_ref, out_ref, h_ref):
    """Unidirectional (forward) GRU recurrence over one block of Tt timesteps."""
    t_blk = pl.program_id(1)

    @pl.when(t_blk == 0)
    def _():
        h_ref[...] = jnp.zeros_like(h_ref)

    Tt = gi_ref.shape[0]
    H = h_ref.shape[-1]
    lens = len_ref[...]
    whh = whh_ref[...]
    bhh = bhh_ref[...].astype(jnp.float32)
    h = h_ref[...]
    zeros = jnp.zeros_like(h)
    t0 = t_blk * Tt

    for i in range(Tt):
        gh = jnp.dot(h.astype(whh.dtype), whh,
                     preferred_element_type=jnp.float32) + bhh
        h_new = _gru_cell(gi_ref[i], gh, h, H)
        valid = (t0 + i) < lens
        h = jnp.where(valid, h_new, h)
        out_ref[i] = jnp.where(valid, h_new, zeros).astype(out_ref.dtype)

    h_ref[...] = h


def _merge_norm_kernel(f_ref, b_ref, o_ref, *, text_norm):
    """(fwd + bwd)/2 then l2norm along the feature dim, on flat rows."""
    emb = (f_ref[...].astype(jnp.float32) + b_ref[...].astype(jnp.float32)) * 0.5
    if text_norm:
        ss = jnp.sum(emb * emb, axis=-1, keepdims=True)
        emb = emb * pl.reciprocal(jnp.sqrt(ss) + 1e-8, approx=False)  # EUP slot
    o_ref[...] = emb.astype(o_ref.dtype)


def _norm_kernel(f_ref, o_ref, *, text_norm):
    """l2norm only (unidirectional path: no redundant (f+f)/2 read)."""
    emb = f_ref[...].astype(jnp.float32)
    if text_norm:
        ss = jnp.sum(emb * emb, axis=-1, keepdims=True)
        emb = emb * pl.reciprocal(jnp.sqrt(ss) + 1e-8, approx=False)
    o_ref[...] = emb.astype(o_ref.dtype)


# ----------------------------------------------------------------------------
# Wrappers around pallas_call
# ----------------------------------------------------------------------------
def input_projection(x2d, w_ih, b_ih, num_dirs, out_dtype):
    """gi = x @ W_ih^T + b_ih over all T*B rows as one big parallel matmul."""
    R, D = x2d.shape
    Gtot = w_ih.shape[1]
    Rt = _pick_row_tile(R)
    nR = R // Rt

    row_spec = pl.BlockSpec((Rt, D), lambda r: (r, 0))
    w_spec = _const_block_spec((D, Gtot), lambda r: (0, 0))
    b_spec = _const_block_spec((1, Gtot), lambda r: (0, 0))
    cparams = pltpu.CompilerParams(dimension_semantics=("parallel",),
                                   vmem_limit_bytes=VMEM_LIMIT_BYTES)

    if num_dirs == 2:
        G = Gtot // 2
        out_spec = pl.BlockSpec((Rt, G), lambda r: (r, 0))
        gf, gb = pl.pallas_call(
            _proj_bi_kernel,
            out_shape=(jax.ShapeDtypeStruct((R, G), out_dtype),
                       jax.ShapeDtypeStruct((R, G), out_dtype)),
            grid_spec=pltpu.PrefetchScalarGridSpec(
                num_scalar_prefetch=0, grid=(nR,),
                in_specs=[row_spec, w_spec, b_spec],
                out_specs=[out_spec, out_spec]),
            compiler_params=cparams,
        )(x2d, w_ih, b_ih)
        return gf, gb

    out_spec = pl.BlockSpec((Rt, Gtot), lambda r: (r, 0))
    g = pl.pallas_call(
        _proj_uni_kernel,
        out_shape=jax.ShapeDtypeStruct((R, Gtot), out_dtype),
        grid_spec=pltpu.PrefetchScalarGridSpec(
            num_scalar_prefetch=0, grid=(nR,),
            in_specs=[row_spec, w_spec, b_spec],
            out_specs=out_spec),
        compiler_params=cparams,
    )(x2d, w_ih, b_ih)
    return (g,)


def bigru_recurrence(gi_f, gi_b, len_col, whh_f, whh_b, bhh_f, bhh_b,
                     *, time_tile, out_dtype):
    """Fused fwd+bwd GRU recurrence over time-major precomputed projections."""
    Tp, B, G = gi_f.shape
    H = G // 3
    Tt = time_tile
    nT = Tp // Tt
    nB = _pick_batch_tiles(B)
    Bt = B // nB

    fwd3 = lambda b, t: (t, b, 0)
    bwd3 = lambda b, t: (nT - 1 - t, b, 0)
    const2 = lambda b, t: (0, 0)
    lens2 = lambda b, t: (b, 0)

    return pl.pallas_call(
        _bigru_block_kernel,
        out_shape=(jax.ShapeDtypeStruct((Tp, B, H), out_dtype),
                   jax.ShapeDtypeStruct((Tp, B, H), out_dtype)),
        grid_spec=pltpu.PrefetchScalarGridSpec(
            num_scalar_prefetch=0,
            grid=(nB, nT),                      # batch tiles x sequential time
            in_specs=[
                pl.BlockSpec((Bt, 1), lens2),               # lengths column
                pl.BlockSpec((Tt, Bt, G), fwd3),            # gi forward
                pl.BlockSpec((Tt, Bt, G), bwd3),            # gi backward (reversed)
                _const_block_spec((H, G), const2),          # W_hh fwd (1-buffered)
                _const_block_spec((H, G), const2),          # W_hh bwd
                _const_block_spec((1, G), const2),          # b_hh fwd
                _const_block_spec((1, G), const2),          # b_hh bwd
            ],
            out_specs=[pl.BlockSpec((Tt, Bt, H), fwd3),
                       pl.BlockSpec((Tt, Bt, H), bwd3)],
            scratch_shapes=[pltpu.VMEM((Bt, H), jnp.float32),
                            pltpu.VMEM((Bt, H), jnp.float32)],
        ),
        compiler_params=pltpu.CompilerParams(
            dimension_semantics=("parallel", "arbitrary"),
            vmem_limit_bytes=VMEM_LIMIT_BYTES),
    )(len_col, gi_f, gi_b, whh_f, whh_b, bhh_f, bhh_b)


def gru_recurrence(gi, len_col, whh, bhh, *, time_tile, out_dtype):
    """Unidirectional (forward) GRU recurrence."""
    Tp, B, G = gi.shape
    H = G // 3
    Tt = time_tile
    nT = Tp // Tt
    nB = _pick_batch_tiles(B)
    Bt = B // nB

    fwd3 = lambda b, t: (t, b, 0)
    const2 = lambda b, t: (0, 0)
    lens2 = lambda b, t: (b, 0)

    return pl.pallas_call(
        _gru_block_kernel,
        out_shape=jax.ShapeDtypeStruct((Tp, B, H), out_dtype),
        grid_spec=pltpu.PrefetchScalarGridSpec(
            num_scalar_prefetch=0, grid=(nB, nT),
            in_specs=[pl.BlockSpec((Bt, 1), lens2),
                      pl.BlockSpec((Tt, Bt, G), fwd3),
                      _const_block_spec((H, G), const2),
                      _const_block_spec((1, G), const2)],
            out_specs=pl.BlockSpec((Tt, Bt, H), fwd3),
            scratch_shapes=[pltpu.VMEM((Bt, H), jnp.float32)],
        ),
        compiler_params=pltpu.CompilerParams(
            dimension_semantics=("parallel", "arbitrary"),
            vmem_limit_bytes=VMEM_LIMIT_BYTES),
    )(len_col, gi, whh, bhh)


def merge_and_l2norm(f2d, b2d, *, text_norm):
    R, H = f2d.shape
    Rt = _pick_row_tile(R)
    nR = R // Rt
    spec = pl.BlockSpec((Rt, H), lambda r: (r, 0))
    return pl.pallas_call(
        functools.partial(_merge_norm_kernel, text_norm=text_norm),
        out_shape=jax.ShapeDtypeStruct((R, H), jnp.float32),
        grid_spec=pltpu.PrefetchScalarGridSpec(
            num_scalar_prefetch=0, grid=(nR,),
            in_specs=[spec, spec], out_specs=spec),
        compiler_params=pltpu.CompilerParams(
            dimension_semantics=("parallel",),
            vmem_limit_bytes=VMEM_LIMIT_BYTES),
    )(f2d, b2d)


def l2norm_only(f2d, *, text_norm):
    if not text_norm:
        return f2d.astype(jnp.float32)
    R, H = f2d.shape
    Rt = _pick_row_tile(R)
    nR = R // Rt
    spec = pl.BlockSpec((Rt, H), lambda r: (r, 0))
    return pl.pallas_call(
        functools.partial(_norm_kernel, text_norm=text_norm),
        out_shape=jax.ShapeDtypeStruct((R, H), jnp.float32),
        grid_spec=pltpu.PrefetchScalarGridSpec(
            num_scalar_prefetch=0, grid=(nR,),
            in_specs=[spec], out_specs=spec),
        compiler_params=pltpu.CompilerParams(
            dimension_semantics=("parallel",),
            vmem_limit_bytes=VMEM_LIMIT_BYTES),
    )(f2d)


# ----------------------------------------------------------------------------
# Full forward
# ----------------------------------------------------------------------------
def encoder_text_region_forward(ids, lengths, params, *, use_bi_gru=True,
                                text_norm=True, time_tile=None):
    """Forward pass of EncoderTextRegion (dropout=0 -> no dropout applied)."""
    # TODO(synk): nn.Dropout (training-time only) is not implemented; dropout=0.
    B, T = ids.shape
    embed_w = params["embed"]
    stream_dtype = embed_w.dtype           # bf16 in production, f32 for tight check

    # Pad the batch to a sublane multiple so the recurrent (B, H) tiles are dense.
    Bp = ((B + 7) // 8) * 8
    if Bp != B:
        ids = jnp.pad(ids, ((0, Bp - B), (0, 0)))
        lengths = jnp.pad(lengths, (0, Bp - B))

    # Time-major embedding gather (no activation transpose on the input side).
    x_tm = jnp.take(embed_w, ids.T, axis=0)                    # (T, Bp, D)

    # Time tiling / padding; padded steps are masked inside the kernel.
    tt = TIME_TILE if time_tile is None else time_tile
    Tt = max(1, min(tt, T))
    Tp = ((T + Tt - 1) // Tt) * Tt
    if Tp != T:
        x_tm = jnp.pad(x_tm, ((0, Tp - T), (0, 0), (0, 0)))

    len_col = lengths.astype(jnp.int32).reshape(Bp, 1)         # tiny VMEM constant

    layer_in = x_tm
    out_f = out_b = None
    H = None
    n_layers = len(params["gru_layers"])
    for li, lp in enumerate(params["gru_layers"]):
        D_in = layer_in.shape[-1]
        x2d = layer_in.reshape(Tp * Bp, D_in)                  # free row-major reshape
        H = lp["w_hh"][0].shape[0]
        if use_bi_gru:
            gf2, gb2 = input_projection(x2d, lp["w_ih"], lp["b_ih"], 2, stream_dtype)
            out_f, out_b = bigru_recurrence(
                gf2.reshape(Tp, Bp, 3 * H), gb2.reshape(Tp, Bp, 3 * H),
                len_col, lp["w_hh"][0], lp["w_hh"][1],
                lp["b_hh"][0], lp["b_hh"][1],
                time_tile=Tt, out_dtype=stream_dtype)
            if li + 1 < n_layers:
                # TODO(synk): emit a fused (Tp,B,2H) output when H % 128 == 0 to
                # avoid this XLA-side concat for stacked layers.
                layer_in = jnp.concatenate([out_f, out_b], axis=-1)
        else:
            (g2,) = input_projection(x2d, lp["w_ih"], lp["b_ih"], 1, stream_dtype)
            out_f = gru_recurrence(g2.reshape(Tp, Bp, 3 * H), len_col,
                                   lp["w_hh"][0], lp["b_hh"][0],
                                   time_tile=Tt, out_dtype=stream_dtype)
            if li + 1 < n_layers:
                layer_in = out_f

    if use_bi_gru:
        cap2d = merge_and_l2norm(out_f.reshape(Tp * Bp, H),
                                 out_b.reshape(Tp * Bp, H), text_norm=text_norm)
    else:
        cap2d = l2norm_only(out_f.reshape(Tp * Bp, H), text_norm=text_norm)

    cap_tm = cap2d.reshape(Tp, Bp, H)[:T, :B]
    # Final batch-first transpose stays in XLA (3-D major-dim transposes are not
    # reliably supported inside Mosaic kernels); single copy of the output.
    return jnp.transpose(cap_tm, (1, 0, 2))                    # (B, T, H)


# ----------------------------------------------------------------------------
# Pure-JAX reference (for correctness check)
# ----------------------------------------------------------------------------
def _gru_ref_dir(x_tbd, lengths, w_ih_t, w_hh_t, b_ih, b_hh, reverse):
    T, B, _ = x_tbd.shape
    H = w_hh_t.shape[0]
    hp = jax.lax.Precision.HIGHEST
    mask = (jnp.arange(T)[:, None] < lengths[None, :]).astype(jnp.float32)[:, :, None]

    def step(h, inp):
        xt, mt = inp
        gi = jnp.dot(xt, w_ih_t, precision=hp) + b_ih
        gh = jnp.dot(h, w_hh_t, precision=hp) + b_hh
        r = jax.nn.sigmoid(gi[:, :H] + gh[:, :H])
        z = jax.nn.sigmoid(gi[:, H:2 * H] + gh[:, H:2 * H])
        n = jnp.tanh(gi[:, 2 * H:] + r * gh[:, 2 * H:])
        hn = (1.0 - z) * n + z * h
        valid = mt > 0.0
        return jnp.where(valid, hn, h), jnp.where(valid, hn, jnp.zeros_like(hn))

    xs = x_tbd[::-1] if reverse else x_tbd
    ms = mask[::-1] if reverse else mask
    _, outs = jax.lax.scan(step, jnp.zeros((B, H), jnp.float32), (xs, ms))
    return outs[::-1] if reverse else outs


def reference_forward(ids, lengths, params, *, use_bi_gru=True, text_norm=True):
    x = jnp.take(params["embed"].astype(jnp.float32), ids.T, axis=0)   # (T, B, D)
    layer_in = x
    outs = []
    for lp in params["gru_layers"]:
        H = lp["w_hh"][0].shape[0]
        outs = []
        dirs = [False, True] if use_bi_gru else [False]
        for d, reverse in enumerate(dirs):
            w_ih = lp["w_ih"][:, d * 3 * H:(d + 1) * 3 * H].astype(jnp.float32)
            b_ih = lp["b_ih"][:, d * 3 * H:(d + 1) * 3 * H].astype(jnp.float32)
            w_hh = lp["w_hh"][d].astype(jnp.float32)
            b_hh = lp["b_hh"][d].astype(jnp.float32)
            outs.append(_gru_ref_dir(layer_in, lengths, w_ih, w_hh, b_ih, b_hh,
                                     reverse))
        layer_in = jnp.concatenate(outs, axis=-1) if use_bi_gru else outs[0]

    emb = (outs[0] + outs[1]) * 0.5 if use_bi_gru else outs[0]
    if text_norm:
        nrm = jnp.sqrt(jnp.sum(emb * emb, axis=-1, keepdims=True)) + 1e-8
        emb = emb / nrm
    return jnp.transpose(emb, (1, 0, 2))


# ----------------------------------------------------------------------------
# Parameter init (nn.Embedding / nn.GRU shapes; W_ih fused across directions
# and pre-transposed ONCE at init; storage dtype selectable, bf16 for prod)
# ----------------------------------------------------------------------------
def init_params(key, vocab_size, word_dim, embed_size, num_layers, use_bi_gru,
                dtype=jnp.bfloat16):
    num_dirs = 2 if use_bi_gru else 1
    keys = jax.random.split(key, 1 + num_layers * num_dirs * 4)
    embed = jax.random.uniform(keys[0], (vocab_size, word_dim),
                               minval=-0.1, maxval=0.1,
                               dtype=jnp.float32).astype(dtype)
    k = 1.0 / (embed_size ** 0.5)
    layers = []
    ki = 1
    for layer in range(num_layers):
        in_dim = word_dim if layer == 0 else embed_size * num_dirs
        w_ih_dirs, b_ih_dirs, w_hh, b_hh = [], [], [], []
        for _ in range(num_dirs):
            w_ih_dirs.append(jax.random.uniform(
                keys[ki + 0], (in_dim, 3 * embed_size), minval=-k, maxval=k,
                dtype=jnp.float32))
            w_hh.append(jax.random.uniform(
                keys[ki + 1], (embed_size, 3 * embed_size), minval=-k, maxval=k,
                dtype=jnp.float32).astype(dtype))
            b_ih_dirs.append(jax.random.uniform(
                keys[ki + 2], (1, 3 * embed_size), minval=-k, maxval=k,
                dtype=jnp.float32))
            b_hh.append(jax.random.uniform(
                keys[ki + 3], (1, 3 * embed_size), minval=-k, maxval=k,
                dtype=jnp.float32).astype(dtype))
            ki += 4
        layers.append(dict(
            w_ih=jnp.concatenate(w_ih_dirs, axis=1).astype(dtype),  # (D_in, 3H*dirs)
            b_ih=jnp.concatenate(b_ih_dirs, axis=1).astype(dtype),  # (1, 3H*dirs)
            w_hh=w_hh,                                              # per-dir (H, 3H)
            b_hh=b_hh))                                             # per-dir (1, 3H)
    return {"embed": embed, "gru_layers": layers}


# ----------------------------------------------------------------------------
if __name__ == "__main__":
    vocab_size, word_dim, embed_size = 20, 32, 32
    num_layers, use_bi_gru, text_norm = 1, True, True
    B, T = 2, 8

    key = jax.random.PRNGKey(0)
    k_ids, k_par = jax.random.split(key)
    ids = jax.random.randint(k_ids, (B, T), 0, vocab_size, dtype=jnp.int32)
    lengths = jnp.array([8, 5], dtype=jnp.int32)   # variable-length captions

    # 1) f32 params: tight check of kernel math / masking / padding.
    # 2) bf16 params (production path): looser tolerance for the bf16 streams.
    for dtype, atol in ((jnp.float32, 1e-5), (jnp.bfloat16, 4e-2)):
        params = init_params(k_par, vocab_size, word_dim, embed_size,
                             num_layers, use_bi_gru, dtype=dtype)
        out = jax.block_until_ready(
            encoder_text_region_forward(ids, lengths, params,
                                        use_bi_gru=use_bi_gru,
                                        text_norm=text_norm))
        ref = jax.block_until_ready(
            reference_forward(ids, lengths, params,
                              use_bi_gru=use_bi_gru, text_norm=text_norm))
        assert out.shape == (B, T, embed_size), out.shape
        err = float(jnp.max(jnp.abs(out - ref)))
        assert err <= atol, (str(dtype), err)

    print("KERNEL_OK")
</pallas_src>

<mosaic_0001>
module attributes {stable_mosaic.version = 11 : i64} {
  func.func @_probe_kernel(%arg0: i32, %arg1: memref<8x128xf32, #tpu.memory_space<vmem>>, %arg2: memref<8x128xf32, #tpu.memory_space<vmem>>) attributes {dimension_semantics = [#tpu.dimension_semantics<arbitrary>], iteration_bounds = array<i64: 2>, scalar_prefetch = 0 : i64, scratch_operands = 0 : i64, tpu.core_type = #tpu.core_type<tc>, window_params = [{pipeline_mode = #tpu.pipeline_mode<synchronous>, transform_indices = @transform_0, window_bounds = array<i64: 8, 128>}, {transform_indices = @transform_1, window_bounds = array<i64: 8, 128>}]} {
    %c0 = arith.constant 0 : index
    %c0_0 = arith.constant 0 : index
    %0 = vector.load %arg1[%c0, %c0_0] : memref<8x128xf32, #tpu.memory_space<vmem>>, vector<8x128xf32>
    %c0_1 = arith.constant 0 : index
    %c0_2 = arith.constant 0 : index
    %1 = vector.load %arg2[%c0_1, %c0_2] : memref<8x128xf32, #tpu.memory_space<vmem>>, vector<8x128xf32>
    tpu.vector_store %arg2[%c0_1, %c0_2], %0 {strides = array<i32>} : memref<8x128xf32, #tpu.memory_space<vmem>>, vector<8x128xf32>,
    return
  }
  func.func @transform_0(%arg0: i32) -> (i32, i32) {
    %c0_i32 = arith.constant 0 : i32
    %c0_i32_0 = arith.constant 0 : i32
    %c0_i32_1 = arith.constant 0 : i32
    return %c0_i32, %c0_i32_0 : i32, i32
  }
  func.func @transform_1(%arg0: i32) -> (i32, i32) {
    %c0_i32 = arith.constant 0 : i32
    %c0_i32_0 = arith.constant 0 : i32
    return %arg0, %c0_i32 : i32, i32
  }
}

module attributes {stable_mosaic.version = 11 : i64} {
  func.func @_proj_bi_kernel(%arg0: i32, %arg1: memref<64x32xf32, #tpu.memory_space<vmem>>, %arg2: memref<32x192xf32, #tpu.memory_space<vmem>>, %arg3: memref<1x192xf32, #tpu.memory_space<vmem>>, %arg4: memref<64x96xf32, #tpu.memory_space<vmem>>, %arg5: memref<64x96xf32, #tpu.memory_space<vmem>>) attributes {dimension_semantics = [#tpu.dimension_semantics<parallel>], iteration_bounds = array<i64: 1>, scalar_prefetch = 0 : i64, scratch_operands = 0 : i64, tpu.core_type = #tpu.core_type<tc>, window_params = [{transform_indices = @transform_0, window_bounds = array<i64: 64, 32>}, {pipeline_mode = #tpu.pipeline_mode<synchronous>, transform_indices = @transform_1, window_bounds = array<i64: 32, 192>}, {pipeline_mode = #tpu.pipeline_mode<synchronous>, transform_indices = @transform_2, window_bounds = array<i64: 1, 192>}, {transform_indices = @transform_3, window_bounds = array<i64: 64, 96>}, {transform_indices = @transform_4, window_bounds = array<i64: 64, 96>}]} {
    %c0 = arith.constant 0 : index
    %c0_0 = arith.constant 0 : index
    %0 = vector.load %arg1[%c0, %c0_0] : memref<64x32xf32, #tpu.memory_space<vmem>>, vector<64x32xf32>
    %c0_1 = arith.constant 0 : index
    %c0_2 = arith.constant 0 : index
    %1 = vector.load %arg2[%c0_1, %c0_2] : memref<32x192xf32, #tpu.memory_space<vmem>>, vector<32x192xf32>
    %cst = arith.constant dense<0.000000e+00> : vector<64x192xf32>
    %2 = tpu.matmul %0, %1, %cst {dimension_numbers = #tpu.dot_dimension_numbers<[1], [0], [0], [1], [0, 0, 1, 1], [], []>} : vector<64x32xf32>, vector<32x192xf32>, vector<64x192xf32> -> vector<64x192xf32>
    %c0_3 = arith.constant 0 : index
    %c0_4 = arith.constant 0 : index
    %3 = vector.load %arg3[%c0_3, %c0_4] : memref<1x192xf32, #tpu.memory_space<vmem>>, vector<1x192xf32>
    %4 = vector.broadcast %3 : vector<1x192xf32> to vector<64x192xf32>
    %5 = arith.addf %2, %4 : vector<64x192xf32>
    %6 = vector.extract_strided_slice %5 {offsets = [0, 0], sizes = [64, 96], strides = [1, 1]} : vector<64x192xf32> to vector<64x96xf32>
    %c0_5 = arith.constant 0 : index
    %c0_6 = arith.constant 0 : index
    %7 = vector.load %arg4[%c0_5, %c0_6] : memref<64x96xf32, #tpu.memory_space<vmem>>, vector<64x96xf32>
    tpu.vector_store %arg4[%c0_5, %c0_6], %6 {strides = array<i32>} : memref<64x96xf32, #tpu.memory_space<vmem>>, vector<64x96xf32>,
    %8 = vector.extract_strided_slice %5 {offsets = [0, 96], sizes = [64, 96], strides = [1, 1]} : vector<64x192xf32> to vector<64x96xf32>
    %c0_7 = arith.constant 0 : index
    %c0_8 = arith.constant 0 : index
    %9 = vector.load %arg5[%c0_7, %c0_8] : memref<64x96xf32, #tpu.memory_space<vmem>>, vector<64x96xf32>
    tpu.vector_store %arg5[%c0_7, %c0_8], %8 {strides = array<i32>} : memref<64x96xf32, #tpu.memory_space<vmem>>, vector<64x96xf32>,
    return
  }
  func.func @transform_0(%arg0: i32) -> (i32, i32) {
    %c0_i32 = arith.constant 0 : i32
    %c0_i32_0 = arith.constant 0 : i32
    return %arg0, %c0_i32 : i32, i32
  }
  func.func @transform_1(%arg0: i32) -> (i32, i32) {
    %c0_i32 = arith.constant 0 : i32
    %c0_i32_0 = arith.constant 0 : i32
    %c0_i32_1 = arith.constant 0 : i32
    return %c0_i32, %c0_i32_0 : i32, i32
  }
  func.func @transform_2(%arg0: i32) -> (i32, i32) {
    %c0_i32 = arith.constant 0 : i32
    %c0_i32_0 = arith.constant 0 : i32
    %c0_i32_1 = arith.constant 0 : i32
    return %c0_i32, %c0_i32_0 : i32, i32
  }
  func.func @transform_3(%arg0: i32) -> (i32, i32) {
    %c0_i32 = arith.constant 0 : i32
    %c0_i32_0 = arith.constant 0 : i32
    return %arg0, %c0_i32 : i32, i32
  }
  func.func @transform_4(%arg0: i32) -> (i32, i32) {
    %c0_i32 = arith.constant 0 : i32
    %c0_i32_0 = arith.constant 0 : i32
    return %arg0, %c0_i32 : i32, i32
  }
}

</mosaic_0001>

<bundles_post_ra>
// kernel: tpu_custom_call.1
= control target key start
LH: loop header
LB: loop body
LE: loop exit
PB: predicated region body
PF: predicated region fallthrough
CT: control target
= control target key end

     0   :  { %6 = vsyncpa [#allocation3], 0  ;;  %s440_s0 = inlined_call_operand.hbm [shape: f32[8,128], index: 0, kind: input, shape index: {}]   ;;  %s441_s1 = inlined_call_operand.hbm [shape: f32[16,128], index: 1, kind: output, shape index: {}]  }
   0x1   :  { %7 = vsyncpa [#allocation4], 0 }
   0x2   :  { %9 = vsyncpa [#allocation4 + $0x1], 0  ;;  %s356_s6 = smov 0   ;;  %s358_s7 = smov 0  }
   0x3   :  { %s360_s8 = smov 0   ;;  %s362_s9 = smov 0  }
   0x4 LB: > { %s377_s10 = sadd.s32 4294967295, %s343_s9   ;;  %s187_s11 = sadd.s32 4294967294, %s343_s9   ;;  %s343_s9 = sphi %s362_s9, %s447_s9   ;;  %s339_s8 = sphi %s360_s8, %s446_s8   ;;  %s335_s7 = sphi %s358_s7, %s445_s7   ;;  %s331_s6 = sphi %s356_s6, %s444_s6  }
   0x5   : > { %s381_s12 = sadd.s32 1, %s343_s9   ;;  %s43_s13 = sadd.s32 1, %s339_s8 }
   0x6   : > { %s40_s14 = ssub.s32 %s343_s9, %s381_s12  ;;  %p53_p0 = scmp.ne.s32.totalorder %s339_s8, %s335_s7 }
   0x7   : > { %p41_p1 = scmp.eq.s32.totalorder %s40_s14, 0  ;;  %p54_p2 = scmp.eq.s32.totalorder %s377_s10, 1 }
   0x8   : > { %p59_p3 = scmp.ne.s32.totalorder %s335_s7, %s331_s6  ;;  %p60_p4 = scmp.eq.s32.totalorder %s187_s11, 1 }
   0x9   : > { %s392_s15 = scalar_select %p41_p1, %s339_s8, %s43_s13  }
   0xa   : > { %p394_p5 = por %p54_p2, %p53_p0  ;;  %p398_p6 = por %p60_p4, %p59_p3 }
   0xb   : > { %p188_p7 = scmp.ge.s32.totalorder %s343_s9, 1  ;;  %p67_p8 = scmp.lt.s32.totalorder %s343_s9, 3 }
   0xc   : > { %p211_p9 = scmp.eq.s32.totalorder %s377_s10, 0  ;;  %s79_s20 = sshll.u32 %s440_s0, 4  ;;  %s80_s20 = int_to_ptr.hbm [resolvable:$true] %s79_s20 }
   0xd   : > { %p68_p10 = pnand %p188_p7, %p67_p8  ;;  %s345_s21 = smov [#allocation2]  }
   0xe   : > { %s81_s22 = sshll.u32 %s345_s21, 4  ;;  %s82_s22 = int_to_ptr.vmem [resolvable:$true] %s81_s22 }
   0xf   : > { %p203_p11 = pneg %p68_p10  ;;  %94 = sbr.rel (%p68_p10) target bundleno = 37 (0x25), region = 24 }
  0x11   : > { %p204_p12 = pnand %p211_p9, %p203_p11 }
  0x13   : > { %206 = dma.hbm_to_vmem [thread:$0]  (!%p204_p12), %s80_s20, 128, %s82_s22, [#allocation3]  }
  0x14   : > { %322 = dma.done.wait (%p211_p9), [#allocation3], 128  }
  0x15   : > { %324 = vsyncadd (%p211_p9), [#allocation3], 4294967168  ;;  %s107_s23 = sand.u32 1, %s335_s7   ;;  %s194_s24 = sshll.u32 %s377_s10, 3  ;;  %v110_v0 = vld [vmem:[#allocation2] sm:$0xff] }
  0x16   : > { %s192_s25 = sshll.u32 %s107_s23, 3  ;;  %s123_s28 = scalar_lea.hbm %s441_s1, %s194_s24 }
  0x17   : > { %s109_s29 = scalar_lea.vmem [#allocation5], %s192_s25  ;;  %s127_s2 = sshll.u32 %s123_s28, 4  ;;  %s128_s2 = int_to_ptr.hbm [resolvable:$true] %s127_s2 }
  0x18   : > { %s125_s30 = sshll.u32 %s109_s29, 4  ;;  %111 = vst [vmem:[%s109_s29] sm:$0xff] %v110_v0  ;;  %s113_s3 = scalar_lea.sflag [#allocation4], %s107_s23  ;;  %s126_s30 = int_to_ptr.vmem [resolvable:$true] %s125_s30 }
  0x19   : > { %s291_s4 = sshra.s32 %s128_s2, 4  ;;  %s297_s13 = scalar_lea.hbm %s441_s1, 16  ;;  %s292_s4 = int_to_ptr.hbm [resolvable:$true] %s291_s4 }
  0x1a   : > { %s293_s5 = scalar_lea.hbm %s292_s4, 8  ;;  %p298_p2 = scmp.lt.s32.totalorder %s292_s4, %s441_s1 }
  0x1b   : > { %p294_p13 = scmp.ne.s32.totalorder %s292_s4, %s293_s5  ;;  %p299_p3 = scmp.lt.s32.totalorder %s297_s13, %s293_s5 }
  0x1d   : > { %p295_p0 = pnand %p294_p13, %p394_p5  ;;  %p300_p4 = por %p299_p3, %p298_p2 }
  0x1f   : > { %p296_p1 = pneg %p295_p0 }
  0x21   : > { %p301_p7 = pnand %p300_p4, %p296_p1 }
  0x23   : > { %304 = shalt.err (!%p301_p7)
}
  0x24   : > { %201 = dma.vmem_to_hbm [thread:$0]  (%p394_p5), %s126_s30, 128, %s128_s2, %s113_s3  }
  0x25 PF: > { %p213_p8 = scmp.ge.s32.totalorder %s343_s9, 2  ;;  %s139_s19 = sand.u32 1, %s331_s6  }
  0x26   : > { %s140_s20 = scalar_lea.sflag [#allocation4], %s139_s19 }
  0x27   : > { %p208_p9 = pnand %p213_p8, %p398_p6 }
  0x29   : > { %p209_p10 = pneg %p208_p9 }
  0x2b   : > { %326 = dma.done.wait (%p209_p10), %s140_s20, 128  }
  0x2c   : > { %328 = vsyncadd (%p209_p10), %s140_s20, 4294967168  ;;  %p12_p11 = scmp.ge.s32.totalorder %s381_s12, 4   ;;  %s444_s6 = smov %s335_s7 }
  0x2d   : > { %s445_s7 = smov %s339_s8  ;;  %s446_s8 = smov %s392_s15 }
  0x2e   : > { %s447_s9 = smov %s381_s12  ;;  %14 = sbr.rel (!%p12_p11) target bundleno = 4 (0x4), region = 61 }
  0x33   :  { %146 = vsyncpa [#allocation3], 1 }
  0x34   :  { %148 = vsyncpa [#allocation3 + $0x1], 1 }
  0x35   :  { %149 = vsyncpa [#allocation4], 1 }
  0x36   :  { %151 = vsyncpa [#allocation4 + $0x1], 1 }

// kernel: tpu_custom_call.1
= control target key start
LH: loop header
LB: loop body
LE: loop exit
PB: predicated region body
PF: predicated region fallthrough
CT: control target
= control target key end

     0   :  { %10 = vsyncpa [#allocation3], 0  ;;  %vm40_vm0 = vcmask 261120   ;;  %s494_s0 = inlined_call_operand.vmem [shape: f32[64,32], index: 0, kind: input, shape index: {}]   ;;  %s495_s1 = inlined_call_operand.vmem [shape: f32[32,192], index: 1, kind: input, shape index: {}]   ;;  %s496_s2 = inlined_call_operand.vmem [shape: f32[1,192], index: 2, kind: input, shape index: {}]   ;;  %s497_s3 = inlined_call_operand.hbm [shape: f32[64,96], index: 3, kind: output, shape index: {0}]   ;;  %s498_s4 = inlined_call_operand.hbm [shape: f32[64,96], index: 4, kind: output, shape index: {1}]  }
   0x1   :  { %v32_v0 = vld [vmem:[%s495_s1 + $0x30] sm:$0xff]  ;;  %v33_v1 = vld [vmem:[%s495_s1 + $0x38] sm:$0xff]  ;;  %v30_v2 = vld [vmem:[%s495_s1 + $0x20] sm:$0xff] }
   0x2   :  { %77 = vmatpush.msra.mxu0 %v32_v0  ;;  %280 = vmatpush.msra.mxu2 %v32_v0  ;;  %v31_v3 = vld [vmem:[%s495_s1 + $0x28] sm:$0xff]  ;;  %v28_v4 = vld [vmem:[%s495_s1 + $0x10] sm:$0xff]  ;;  %v29_v5 = vld [vmem:[%s495_s1 + $0x18] sm:$0xff] }
   0x3   :  { %284 = vmatpush.msra.mxu3 %v33_v1  ;;  %118 = vmatpush.msra.mxu1 %v33_v1  ;;  %v26_v6 = vld [vmem:[%s495_s1] sm:$0xff]  ;;  %v27_v7 = vld [vmem:[%s495_s1 + $0x8] sm:$0xff] }
   0x4   :  { %78 = vmatpush.msra.mxu0 %v30_v2  ;;  %281 = vmatpush.msra.mxu2 %v30_v2  ;;  %v18_v8 = vld [vmem:[%s494_s0] sm:$0xff] }
   0x5   :  { %285 = vmatpush.msra.mxu3 %v31_v3  ;;  %119 = vmatpush.msra.mxu1 %v31_v3 }
   0x6   :  { %79 = vmatpush.msra.mxu0 %v28_v4  ;;  %282 = vmatpush.msra.mxu2 %v28_v4 }
   0x7   :  { %11 = vsyncpa [#allocation5], 0  ;;  %286 = vmatpush.msra.mxu3 %v29_v5  ;;  %v22_v9 = vld [vmem:[%s494_s0 + $0x20] sm:$0xff]  ;;  %120 = vmatpush.msra.mxu1 %v29_v5  ;;  %v19_v10 = vld [vmem:[%s494_s0 + $0x8] sm:$0xff]  ;;  %vm147_vm1 = vcmask 785408   ;;  %s345_s22 = smov 32  }
   0x8   :  { %80 = vmatpush.msra.mxu0 %v26_v6  ;;  %283 = vmatpush.msra.mxu2 %v26_v6  ;;  %v23_v11 = vld [vmem:[%s494_s0 + $0x28] sm:$0xff]  ;;  %v20_v12 = vld [vmem:[%s494_s0 + $0x10] sm:$0xff]  ;;  %v21_v14 = vld [vmem:[%s494_s0 + $0x18] sm:$0xff]  ;;  %s234_s25 = sshll.u32 %s497_s3, 4  ;;  %s347_s26 = smov 128   ;;  %s235_s25 = int_to_ptr.hbm [resolvable:$true] %s234_s25 }
   0x9   :  { %287 = vmatpush.msra.mxu3 %v27_v7  ;;  %264 = vmatmul.msk.f32.vlgmr.msra.gmra.mxu0 %vm40_vm0, %v18_v8  ;;  %v24_v13 = vld [vmem:[%s494_s0 + $0x30] sm:$0xff]  ;;  %v25_v15 = vld [vmem:[%s494_s0 + $0x38] sm:$0xff]  ;;  %v34_v16 = vld [vmem:[%s496_s2] sm:$0x3]  ;;  %s346_s0 = smov [#allocation2]   ;;  %s348_s27 = smov 8  }
   0xa   :  { %268 = vmatmul.msk.f32.vlgmr.msra.gmra.mxu2 %vm40_vm0, %v22_v9  ;;  %276 = vmatmul.msk.f32.vlgmr.msra.gmra.mxu3 %vm40_vm0, %v22_v9  ;;  %v36_v17 = vperm.slane %v34_v16, 0  ;;  %v37_v20 = vperm.slane %v34_v16, 1  ;;  %s232_s2 = sshll.u32 %s346_s0, 4  ;;  %s349_s3 = smov [#allocation4]   ;;  %s233_s2 = int_to_ptr.vmem [resolvable:$true] %s232_s2 }
   0xb   :  { %121 = vmatpush.msra.mxu1 %v27_v7  ;;  %s245_s28 = sshll.u32 %s349_s3, 4  ;;  %s247_s5 = sshll.u32 %s498_s4, 4  ;;  %s246_s28 = int_to_ptr.vmem [resolvable:$true] %s245_s28  ;;  %s248_s5 = int_to_ptr.hbm [resolvable:$true] %s247_s5 }
   0xc   :  { %272 = vmatmul.msk.f32.vlgmr.msra.gmra.mxu1 %vm40_vm0, %v18_v8 }
  0x11   :  { %265 = vmatmul.msk.f32.gmra.mxu0 %vm40_vm0, %v19_v10 }
  0x12   :  { %277 = vmatmul.msk.f32.gmra.mxu3 %vm40_vm0, %v23_v11  ;;  %269 = vmatmul.msk.f32.gmra.mxu2 %vm40_vm0, %v23_v11 }
  0x14   :  { %273 = vmatmul.msk.f32.gmra.mxu1 %vm40_vm0, %v19_v10 }
  0x19   :  { %266 = vmatmul.msk.f32.gmra.mxu0 %vm40_vm0, %v20_v12 }
  0x1a   :  { %270 = vmatmul.msk.f32.gmra.mxu2 %vm40_vm0, %v24_v13  ;;  %278 = vmatmul.msk.f32.gmra.mxu3 %vm40_vm0, %v24_v13 }
  0x1c   :  { %274 = vmatmul.msk.f32.gmra.mxu1 %vm40_vm0, %v20_v12 }
  0x21   :  { %267 = vmatmul.msk.f32.gmra.mxu0 %vm40_vm0, %v21_v14 }
  0x22   :  { %279 = vmatmul.msk.f32.gmra.mxu3 %vm40_vm0, %v25_v15  ;;  %271 = vmatmul.msk.f32.gmra.mxu2 %vm40_vm0, %v25_v15 }
  0x24   :  { %275 = vmatmul.msk.f32.gmra.mxu1 %vm40_vm0, %v21_v14 }
  0x86   :  { %v82_v18 = vpop.f32.mrf.mxu0 }
  0x87   :  { %v83_v19 = vadd.f32 %v82_v18, %v36_v17 }
  0x89   :  { %148 = vst.msk [vmem:[#allocation2] sm:$0xff] %vm147_vm1, %v83_v19  ;;  %172 = vrot.lane.b32.xlu0 %v83_v19, %s345_s22  ;;  %v123_v21 = vpop.f32.mrf.mxu1 }
  0x8a   :  { %v124_v24 = vadd.f32 %v123_v21, %v37_v20 }
  0x8d   :  { %v94_v22 = vpop.f32.mrf.mxu2  ;;  %v135_v23 = vpop.f32.mrf.mxu3 }
  0x8e   :  { %v95_v25 = vadd.f32 %v94_v22, %v36_v17  ;;  %v85_v26 = vpop.f32.mrf.mxu0  ;;  %v136_v29 = vadd.f32 %v135_v23, %v37_v20 }
  0x8f   :  { %v86_v27 = vadd.f32 %v85_v26, %v36_v17 }
  0x90   :  { %152 = vst.msk [vmem:[#allocation2 + $0x20] sm:$0xff] %vm147_vm1, %v95_v25  ;;  %188 = vrot.lane.b32.xlu2 %v95_v25, %s345_s22 }
  0x91   :  { %149 = vst.msk [vmem:[#allocation2 + $0x8] sm:$0xff] %vm147_vm1, %v86_v27  ;;  %176 = vrot.lane.b32.xlu1 %v86_v27, %s345_s22  ;;  %174 = vrot.lane.b32.xlu0 %v124_v24, %s345_s22  ;;  %v126_v28 = vpop.f32.mrf.mxu1 }
  0x92   :  { %v127_v32 = vadd.f32 %v126_v28, %v37_v20 }
  0x95   :  { %v138_v30 = vpop.f32.mrf.mxu3  ;;  %v97_v31 = vpop.f32.mrf.mxu2 }
  0x96   :  { %v139_v33 = vadd.f32 %v138_v30, %v37_v20  ;;  %v98_v34 = vadd.f32 %v97_v31, %v36_v17  ;;  %v88_v35 = vpop.f32.mrf.mxu0 }
  0x97   :  { %v89_v36 = vadd.f32 %v88_v35, %v36_v17 }
  0x98   :  { %153 = vst.msk [vmem:[#allocation2 + $0x28] sm:$0xff] %vm147_vm1, %v98_v34  ;;  %194 = vrot.lane.b32.xlu2 %v139_v33, %s345_s22 }
  0x99   :  { %178 = vrot.lane.b32.xlu1 %v127_v32, %s345_s22  ;;  %190 = vrot.lane.b32.xlu0 %v136_v29, %s345_s22  ;;  %150 = vst.msk [vmem:[#allocation2 + $0x10] sm:$0xff] %vm147_vm1, %v89_v36  ;;  %v129_v37 = vpop.f32.mrf.mxu1 }
  0x9a   :  { %v130_v46 = vadd.f32 %v129_v37, %v37_v20 }
  0x9d   :  { %v100_v38 = vpop.f32.mrf.mxu2  ;;  %v141_v42 = vpop.f32.mrf.mxu3 }
  0x9e   :  { %v101_v39 = vadd.f32 %v100_v38, %v36_v17  ;;  %v91_v40 = vpop.f32.mrf.mxu0  ;;  %v142_v50 = vadd.f32 %v141_v42, %v37_v20 }
  0x9f   :  { %v92_v41 = vadd.f32 %v91_v40, %v36_v17 }
  0xa0   :  { %154 = vst.msk [vmem:[#allocation2 + $0x30] sm:$0xff] %vm147_vm1, %v101_v39  ;;  %180 = vrot.lane.b32.xlu2 %v89_v36, %s345_s22 }
  0xa1   :  { %192 = vrot.lane.b32.xlu1 %v98_v34, %s345_s22  ;;  %196 = vrot.lane.b32.xlu0 %v101_v39, %s345_s22  ;;  %151 = vst.msk [vmem:[#allocation2 + $0x18] sm:$0xff] %vm147_vm1, %v92_v41  ;;  %v132_v43 = vpop.f32.mrf.mxu1 }
  0xa2   :  { %v133_v44 = vadd.f32 %v132_v43, %v37_v20 }
  0xa5   :  { %v103_v45 = vpop.f32.mrf.mxu2  ;;  %v144_v48 = vpop.f32.mrf.mxu3 }
  0xa6   :  { %v104_v47 = vadd.f32 %v103_v45, %v36_v17  ;;  %v145_v49 = vadd.f32 %v144_v48, %v37_v20 }
  0xa8   :  { %182 = vrot.lane.b32.xlu2 %v130_v46, %s345_s22  ;;  %155 = vst.msk [vmem:[#allocation2 + $0x38] sm:$0xff] %vm147_vm1, %v104_v47 }
  0xa9   :  { %186 = vrot.lane.b32.xlu1 %v133_v44, %s345_s22  ;;  %184 = vrot.lane.b32.xlu0 %v92_v41, %s345_s22 }
  0xaa   :  { %240 = dma.vmem_to_hbm [thread:$0]  %s233_s2, 1024, %s235_s25, [#allocation3], %s347_s26, %s347_s26, %s348_s27  }
  0xb0   :  { %200 = vrot.lane.b32.xlu2 %v104_v47, %s345_s22 }
  0xb1   :  { %198 = vrot.lane.b32.xlu1 %v142_v50, %s345_s22  ;;  %202 = vrot.lane.b32.xlu0 %v145_v49, %s345_s22 }
  0xea   :  { %v189_v51 = vpop.permute.xlu2 %188 }
  0xf2   :  { %v195_v52 = vpop.permute.xlu2 %194 }
  0xfa   :  { %v181_v53 = vpop.permute.xlu2 %180 }
  0xfb   :  { %v173_v54 = vpop.permute.xlu0 %172 }
 0x102   :  { %v183_v55 = vpop.permute.xlu2 %182 }
 0x103   :  { %v206_v56 = vsel %vm40_vm0, %v181_v53, %v183_v55  ;;  %v177_v57 = vpop.permute.xlu1 %176  ;;  %v175_v58 = vpop.permute.xlu0 %174 }
 0x104   :  { %222 = vst.msk [vmem:[#allocation4 + $0x10] sm:$0xff] %vm147_vm1, %v206_v56  ;;  %v204_v59 = vsel %vm40_vm0, %v173_v54, %v175_v58 }
 0x105   :  { %220 = vst.msk [vmem:[#allocation4] sm:$0xff] %vm147_vm1, %v204_v59 }
 0x10a   :  { %v201_v6 = vpop.permute.xlu2 %200 }
 0x10b   :  { %v179_v60 = vpop.permute.xlu1 %178  ;;  %v191_v61 = vpop.permute.xlu0 %190 }
 0x10c   :  { %v205_v62 = vsel %vm40_vm0, %v177_v57, %v179_v60  ;;  %v208_v63 = vsel %vm40_vm0, %v189_v51, %v191_v61 }
 0x10d   :  { %221 = vst.msk [vmem:[#allocation4 + $0x8] sm:$0xff] %vm147_vm1, %v205_v62 }
 0x10e   :  { %224 = vst.msk [vmem:[#allocation4 + $0x20] sm:$0xff] %vm147_vm1, %v208_v63 }
 0x113   :  { %v193_v0 = vpop.permute.xlu1 %192  ;;  %v197_v1 = vpop.permute.xlu0 %196 }
 0x114   :  { %v209_v2 = vsel %vm40_vm0, %v193_v0, %v195_v52 }
 0x115   :  { %225 = vst.msk [vmem:[#allocation4 + $0x28] sm:$0xff] %vm147_vm1, %v209_v2 }
 0x11b   :  { %v187_v3 = vpop.permute.xlu1 %186  ;;  %v185_v4 = vpop.permute.xlu0 %184 }
 0x11c   :  { %v207_v5 = vsel %vm40_vm0, %v185_v4, %v187_v3 }
 0x11d   :  { %223 = vst.msk [vmem:[#allocation4 + $0x18] sm:$0xff] %vm147_vm1, %v207_v5 }
 0x123   :  { %v199_v7 = vpop.permute.xlu1 %198  ;;  %v203_v8 = vpop.permute.xlu0 %202 }
 0x124   :  { %v210_v9 = vsel %vm40_vm0, %v197_v1, %v199_v7  ;;  %v211_v10 = vsel %vm40_vm0, %v201_v6, %v203_v8 }
 0x125   :  { %226 = vst.msk [vmem:[#allocation4 + $0x30] sm:$0xff] %vm147_vm1, %v210_v9 }
 0x126   :  { %227 = vst.msk [vmem:[#allocation4 + $0x38] sm:$0xff] %vm147_vm1, %v211_v10 }
 0x127   :  { %253 = dma.vmem_to_hbm [thread:$0]  %s246_s28, 1024, %s248_s5, [#allocation5], %s347_s26, %s347_s26, %s348_s27  }
 0x128   :  { %341 = dma.done.wait [#allocation3], 1024  }
 0x129   :  { %342 = vsyncadd [#allocation3], 4294966272 }
 0x12a   :  { %343 = dma.done.wait [#allocation5], 1024  }
 0x12b   :  { %344 = vsyncadd [#allocation5], 4294966272 }
 0x12c   :  { %262 = vsyncpa [#allocation3], 1 }
 0x12d   :  { %263 = vsyncpa [#allocation5], 1 }

</bundles_post_ra>
